<compile_context>
chip_gen: v6e
topology: v6e:2x2x1
jax: 0.10.0
libtpu: 0.0.40
codegen_flags: <defaults>
</compile_context>

<pallas_src>
import math

import jax
import jax.numpy as jnp
from jax.experimental import pallas as pl
from jax.experimental.pallas import tpu as pltpu


# --------------------------------------------------------------------------- #
# Helpers
# --------------------------------------------------------------------------- #
def _round_up(x, m):
    return ((x + m - 1) // m) * m


def _vmem_capacity_bytes():
    """Per-core VMEM capacity; conservative 64 MiB (v7x) fallback."""
    try:
        info = pltpu.get_tpu_info()
        for attr in ("vmem_capacity_bytes", "vmem_size_bytes", "vmem_bytes"):
            v = getattr(info, attr, None)
            if v:
                return int(v)
    except Exception:
        pass
    return 64 * 1024 * 1024


_SQRT_2_OVER_PI = 0.7978845608028654


def _gelu_tanh(x):
    # tanh-form GELU: tanh goes to the EUP slot (cheap); deviation from the
    # exact erf GELU (~1e-3) is below bf16-operand matmul noise.
    return 0.5 * x * (1.0 + jnp.tanh(_SQRT_2_OVER_PI * (x + 0.044715 * x * x * x)))


def _resident_footprint(tm, d, h, cbytes, obytes):
    x_io = 2 * tm * d * cbytes            # x tile, double buffered
    o_io = 2 * tm * d * obytes            # out tile, double buffered
    w = 2 * (d * h + h * d) * cbytes      # both weight slabs (worst-case 2 bufs)
    b = 2 * (h + d) * 4
    interm = tm * h * 4 + tm * d * 4      # f32 hidden + epilogue temporaries
    return x_io + o_io + w + b + interm


def _streaming_footprint(tm, th, d, cbytes, obytes):
    x_io = 2 * tm * d * cbytes
    o_io = 2 * tm * d * obytes
    w = 2 * (d * th + th * d) * cbytes
    b = 2 * th * 4 + 2 * d * 4
    acc = tm * d * 4
    interm = tm * th * 4
    return x_io + o_io + w + b + acc + interm


# --------------------------------------------------------------------------- #
# Kernels
# --------------------------------------------------------------------------- #
def _ffn_resident_kernel(x_ref, w1t_ref, b1_ref, w2t_ref, b2_ref, o_ref):
    # Grid: (M tiles,). Weights fully resident in VMEM (constant index_maps).
    h = jnp.dot(x_ref[...], w1t_ref[...], preferred_element_type=jnp.float32)
    h = _gelu_tanh(h + b1_ref[...])                       # f32 elementwise math
    y = jnp.dot(h.astype(w2t_ref.dtype), w2t_ref[...],
                preferred_element_type=jnp.float32)
    o_ref[...] = (y + b2_ref[...]).astype(o_ref.dtype)


def _ffn_streaming_kernel(x_ref, w1t_ref, b1_ref, w2t_ref, b2_ref, o_ref, acc_ref):
    # Grid: (M tiles ["parallel"], H tiles ["arbitrary" reduction]).
    k = pl.program_id(1)

    @pl.when(k == 0)
    def _():
        acc_ref[...] = jnp.zeros_like(acc_ref)

    h = jnp.dot(x_ref[...], w1t_ref[...], preferred_element_type=jnp.float32)
    h = _gelu_tanh(h + b1_ref[...])
    acc_ref[...] += jnp.dot(h.astype(w2t_ref.dtype), w2t_ref[...],
                            preferred_element_type=jnp.float32)

    @pl.when(k == pl.num_programs(1) - 1)
    def _():
        o_ref[...] = (acc_ref[...] + b2_ref[...]).astype(o_ref.dtype)


# --------------------------------------------------------------------------- #
# Wrapper
# --------------------------------------------------------------------------- #
def feed_forward(x, w1, b1, w2, b2, *, compute_dtype=jnp.bfloat16,
                 weight_resident=None, tm=None, th=None):
    """FeedForward forward pass.

    x : [..., D]        input (any leading batch/seq dims)
    w1: [H, D], b1: [H] first nn.Linear (d_model -> d_model*d_mult)
    w2: [D, H], b2: [D] second nn.Linear (d_model*d_mult -> d_model)
    """
    orig_shape = x.shape
    D = orig_shape[-1]
    H = w1.shape[0]
    assert w1.shape == (H, D) and w2.shape == (D, H)
    assert b1.shape == (H,) and b2.shape == (D,)

    out_dtype = x.dtype
    M = math.prod(orig_shape[:-1])

    cbytes = jnp.dtype(compute_dtype).itemsize
    obytes = jnp.dtype(out_dtype).itemsize
    sub = 16 if cbytes < 4 else 8                 # min sublane tile

    # --- MXU operand prep: bf16 matmul operands, f32 biases -----------------
    x2 = x.reshape(M, D).astype(compute_dtype)
    w1t = jnp.transpose(w1).astype(compute_dtype)     # (D, H)
    w2t = jnp.transpose(w2).astype(compute_dtype)     # (H, D)
    b1r = b1.reshape(1, H).astype(jnp.float32)
    b2r = b2.reshape(1, D).astype(jnp.float32)

    # --- generation-aware VMEM budget ----------------------------------------
    vmem_cap = _vmem_capacity_bytes()
    usable = int(0.70 * vmem_cap)
    vmem_limit = int(0.85 * vmem_cap)

    # --- row tile -------------------------------------------------------------
    Ms = _round_up(M, sub)
    auto_tm = tm is None
    if auto_tm:
        tm = min(512, Ms)
        # prefer >=2 row tiles so the "parallel" axis shards across cores (v7x)
        if Ms > 256 and Ms // tm < 2:
            tm = _round_up((Ms + 1) // 2, sub)
    tm = max(sub, _round_up(tm, sub))

    if weight_resident is None:
        weight_resident = _resident_footprint(tm, D, H, cbytes, obytes) <= usable

    cost = pl.CostEstimate(
        flops=4 * M * D * H,                       # two matmuls, 2 flops / MAC
        transcendentals=M * H,                     # one tanh per hidden activation
        bytes_accessed=(M * D * (cbytes + obytes)
                        + 2 * D * H * cbytes + (H + D) * 4),
    )

    if weight_resident:
        if auto_tm:
            while tm > sub and _resident_footprint(tm, D, H, cbytes, obytes) > usable:
                tm = max(sub, _round_up(tm // 2, sub))
        Mp = _round_up(M, tm)
        if Mp != M:
            x2 = jnp.pad(x2, ((0, Mp - M), (0, 0)))
        out = pl.pallas_call(
            _ffn_resident_kernel,
            out_shape=jax.ShapeDtypeStruct((Mp, D), out_dtype),
            grid_spec=pltpu.PrefetchScalarGridSpec(
                num_scalar_prefetch=0,
                grid=(Mp // tm,),
                in_specs=[
                    pl.BlockSpec((tm, D), lambda i: (i, 0)),   # x rows (streamed)
                    pl.BlockSpec((D, H), lambda i: (0, 0)),    # W1^T (resident)
                    pl.BlockSpec((1, H), lambda i: (0, 0)),    # b1   (resident)
                    pl.BlockSpec((H, D), lambda i: (0, 0)),    # W2^T (resident)
                    pl.BlockSpec((1, D), lambda i: (0, 0)),    # b2   (resident)
                ],
                out_specs=pl.BlockSpec((tm, D), lambda i: (i, 0)),
            ),
            compiler_params=pltpu.CompilerParams(
                dimension_semantics=("parallel",),
                vmem_limit_bytes=vmem_limit),
            cost_estimate=cost,
        )(x2, w1t, b1r, w2t, b2r)
    else:
        auto_th = th is None
        if auto_th:
            th = 512
        th = min(_round_up(th, 128), _round_up(H, 128))
        if auto_th or auto_tm:
            while _streaming_footprint(tm, th, D, cbytes, obytes) > usable:
                if auto_th and th > 128:
                    th //= 2                               # shrink th before tm
                elif auto_tm and tm > 256:
                    tm = max(256, _round_up(tm // 2, sub))
                else:
                    break
        Mp = _round_up(M, tm)
        Hp = _round_up(H, th)
        if Mp != M:
            x2 = jnp.pad(x2, ((0, Mp - M), (0, 0)))
        if Hp != H:
            # Padded hidden units: zero W1^T cols + zero b1 -> gelu(0)=0 -> zero
            # contribution through the (also zero) padded W2^T rows.
            w1t = jnp.pad(w1t, ((0, 0), (0, Hp - H)))
            b1r = jnp.pad(b1r, ((0, 0), (0, Hp - H)))
            w2t = jnp.pad(w2t, ((0, Hp - H), (0, 0)))
        out = pl.pallas_call(
            _ffn_streaming_kernel,
            out_shape=jax.ShapeDtypeStruct((Mp, D), out_dtype),
            grid_spec=pltpu.PrefetchScalarGridSpec(
                num_scalar_prefetch=0,
                grid=(Mp // tm, Hp // th),
                in_specs=[
                    pl.BlockSpec((tm, D), lambda i, k: (i, 0)),   # x rows
                    pl.BlockSpec((D, th), lambda i, k: (0, k)),   # W1^T hidden slab
                    pl.BlockSpec((1, th), lambda i, k: (0, k)),   # b1 slab
                    pl.BlockSpec((th, D), lambda i, k: (k, 0)),   # W2^T hidden slab
                    pl.BlockSpec((1, D), lambda i, k: (0, 0)),    # b2
                ],
                out_specs=pl.BlockSpec((tm, D), lambda i, k: (i, 0)),
                scratch_shapes=[pltpu.VMEM((tm, D), jnp.float32)],
            ),
            compiler_params=pltpu.CompilerParams(
                dimension_semantics=("parallel", "arbitrary"),
                vmem_limit_bytes=vmem_limit),
            cost_estimate=cost,
        )(x2, w1t, b1r, w2t, b2r)

    if Mp != M:
        out = out[:M]
    return out.reshape(orig_shape)


def _reference(x, w1, b1, w2, b2):
    """Pure-JAX reference mirroring the PyTorch forward (exact erf GELU)."""
    h = jnp.einsum('...d,hd->...h', x, w1) + b1
    h = jax.nn.gelu(h, approximate=False)
    return jnp.einsum('...h,dh->...d', h, w2) + b2


if __name__ == "__main__":
    # Small, but D/H are multiples of 128 so the real lane/sublane layouts are hit.
    B, L, D, d_mult = 2, 8, 128, 4
    H = D * d_mult

    key = jax.random.PRNGKey(0)
    k1, k2, k3, k4, kx = jax.random.split(key, 5)

    # nn.Linear default init: U(-1/sqrt(fan_in), 1/sqrt(fan_in)) for weight & bias.
    bound1 = 1.0 / (D ** 0.5)
    w1 = jax.random.uniform(k1, (H, D), jnp.float32, minval=-bound1, maxval=bound1)
    b1 = jax.random.uniform(k2, (H,), jnp.float32, minval=-bound1, maxval=bound1)
    bound2 = 1.0 / (H ** 0.5)
    w2 = jax.random.uniform(k3, (D, H), jnp.float32, minval=-bound2, maxval=bound2)
    b2 = jax.random.uniform(k4, (D,), jnp.float32, minval=-bound2, maxval=bound2)

    x = jax.random.normal(kx, (B, L, D), dtype=jnp.float32)
    ref = _reference(x, w1, b1, w2, b2)

    # 1) Default path: bf16 MXU operands, weight-resident (weights fit VMEM).
    #    Tolerances are bf16-operand level (matmuls in bf16, f32 accumulation).
    out = jax.block_until_ready(feed_forward(x, w1, b1, w2, b2))
    assert out.shape == (B, L, D) and out.dtype == x.dtype
    assert jnp.allclose(out, ref, atol=2e-2, rtol=2e-2)

    # 2) Forced streaming (H-tiled accumulator) path, exercised at small size.
    out_s = jax.block_until_ready(
        feed_forward(x, w1, b1, w2, b2, weight_resident=False, tm=16, th=128))
    assert out_s.shape == (B, L, D)
    assert jnp.allclose(out_s, ref, atol=2e-2, rtol=2e-2)

    print("KERNEL_OK")
</pallas_src>

<mosaic_0001>
module attributes {stable_mosaic.version = 11 : i64} {
  func.func @_ffn_resident_kernel(%arg0: i32, %arg1: memref<16x128xbf16, #tpu.memory_space<vmem>>, %arg2: memref<128x512xbf16, #tpu.memory_space<vmem>>, %arg3: memref<1x512xf32, #tpu.memory_space<vmem>>, %arg4: memref<512x128xbf16, #tpu.memory_space<vmem>>, %arg5: memref<1x128xf32, #tpu.memory_space<vmem>>, %arg6: memref<16x128xf32, #tpu.memory_space<vmem>>) attributes {dimension_semantics = [#tpu.dimension_semantics<parallel>], iteration_bounds = array<i64: 1>, scalar_prefetch = 0 : i64, scratch_operands = 0 : i64, tpu.core_type = #tpu.core_type<tc>, window_params = [{transform_indices = @transform_0, window_bounds = array<i64: 16, 128>}, {pipeline_mode = #tpu.pipeline_mode<synchronous>, transform_indices = @transform_1, window_bounds = array<i64: 128, 512>}, {pipeline_mode = #tpu.pipeline_mode<synchronous>, transform_indices = @transform_2, window_bounds = array<i64: 1, 512>}, {pipeline_mode = #tpu.pipeline_mode<synchronous>, transform_indices = @transform_3, window_bounds = array<i64: 512, 128>}, {pipeline_mode = #tpu.pipeline_mode<synchronous>, transform_indices = @transform_4, window_bounds = array<i64: 1, 128>}, {transform_indices = @transform_5, window_bounds = array<i64: 16, 128>}]} {
    %c0 = arith.constant 0 : index
    %c0_0 = arith.constant 0 : index
    %0 = vector.load %arg1[%c0, %c0_0] : memref<16x128xbf16, #tpu.memory_space<vmem>>, vector<16x128xbf16>
    %c0_1 = arith.constant 0 : index
    %c0_2 = arith.constant 0 : index
    %1 = vector.load %arg2[%c0_1, %c0_2] : memref<128x512xbf16, #tpu.memory_space<vmem>>, vector<128x512xbf16>
    %cst = arith.constant dense<0.000000e+00> : vector<16x512xf32>
    %2 = tpu.matmul %0, %1, %cst {dimension_numbers = #tpu.dot_dimension_numbers<[1], [0], [0], [1], [0, 0, 1, 1], [], []>} : vector<16x128xbf16>, vector<128x512xbf16>, vector<16x512xf32> -> vector<16x512xf32>
    %c0_3 = arith.constant 0 : index
    %c0_4 = arith.constant 0 : index
    %3 = vector.load %arg3[%c0_3, %c0_4] : memref<1x512xf32, #tpu.memory_space<vmem>>, vector<1x512xf32>
    %4 = vector.broadcast %3 : vector<1x512xf32> to vector<16x512xf32>
    %5 = arith.addf %2, %4 : vector<16x512xf32>
    %cst_5 = arith.constant 5.000000e-01 : f32
    %6 = vector.broadcast %cst_5 : f32 to vector<16x512xf32>
    %7 = arith.mulf %6, %5 : vector<16x512xf32>
    %cst_6 = arith.constant 4.471500e-02 : f32
    %8 = vector.broadcast %cst_6 : f32 to vector<16x512xf32>
    %9 = arith.mulf %8, %5 : vector<16x512xf32>
    %10 = arith.mulf %9, %5 : vector<16x512xf32>
    %11 = arith.mulf %10, %5 : vector<16x512xf32>
    %12 = arith.addf %5, %11 : vector<16x512xf32>
    %cst_7 = arith.constant 0.797884583 : f32
    %13 = vector.broadcast %cst_7 : f32 to vector<16x512xf32>
    %14 = arith.mulf %13, %12 : vector<16x512xf32>
    %15 = math.tanh %14 : vector<16x512xf32>
    %cst_8 = arith.constant 1.000000e+00 : f32
    %16 = vector.broadcast %cst_8 : f32 to vector<16x512xf32>
    %17 = arith.addf %16, %15 : vector<16x512xf32>
    %18 = arith.mulf %7, %17 : vector<16x512xf32>
    %19 = arith.truncf %18 : vector<16x512xf32> to vector<16x512xbf16>
    %c0_9 = arith.constant 0 : index
    %c0_10 = arith.constant 0 : index
    %20 = vector.load %arg4[%c0_9, %c0_10] : memref<512x128xbf16, #tpu.memory_space<vmem>>, vector<512x128xbf16>
    %cst_11 = arith.constant dense<0.000000e+00> : vector<16x128xf32>
    %21 = tpu.matmul %19, %20, %cst_11 {dimension_numbers = #tpu.dot_dimension_numbers<[1], [0], [0], [1], [0, 0, 1, 1], [], []>} : vector<16x512xbf16>, vector<512x128xbf16>, vector<16x128xf32> -> vector<16x128xf32>
    %c0_12 = arith.constant 0 : index
    %c0_13 = arith.constant 0 : index
    %22 = vector.load %arg5[%c0_12, %c0_13] : memref<1x128xf32, #tpu.memory_space<vmem>>, vector<1x128xf32>
    %23 = vector.broadcast %22 : vector<1x128xf32> to vector<16x128xf32>
    %24 = arith.addf %21, %23 : vector<16x128xf32>
    %c0_14 = arith.constant 0 : index
    %c0_15 = arith.constant 0 : index
    %25 = vector.load %arg6[%c0_14, %c0_15] : memref<16x128xf32, #tpu.memory_space<vmem>>, vector<16x128xf32>
    tpu.vector_store %arg6[%c0_14, %c0_15], %24 {strides = array<i32>} : memref<16x128xf32, #tpu.memory_space<vmem>>, vector<16x128xf32>,
    return
  }
  func.func @transform_0(%arg0: i32) -> (i32, i32) {
    %c0_i32 = arith.constant 0 : i32
    %c0_i32_0 = arith.constant 0 : i32
    return %arg0, %c0_i32 : i32, i32
  }
  func.func @transform_1(%arg0: i32) -> (i32, i32) {
    %c0_i32 = arith.constant 0 : i32
    %c0_i32_0 = arith.constant 0 : i32
    %c0_i32_1 = arith.constant 0 : i32
    return %c0_i32, %c0_i32_0 : i32, i32
  }
  func.func @transform_2(%arg0: i32) -> (i32, i32) {
    %c0_i32 = arith.constant 0 : i32
    %c0_i32_0 = arith.constant 0 : i32
    %c0_i32_1 = arith.constant 0 : i32
    return %c0_i32, %c0_i32_0 : i32, i32
  }
  func.func @transform_3(%arg0: i32) -> (i32, i32) {
    %c0_i32 = arith.constant 0 : i32
    %c0_i32_0 = arith.constant 0 : i32
    %c0_i32_1 = arith.constant 0 : i32
    return %c0_i32, %c0_i32_0 : i32, i32
  }
  func.func @transform_4(%arg0: i32) -> (i32, i32) {
    %c0_i32 = arith.constant 0 : i32
    %c0_i32_0 = arith.constant 0 : i32
    %c0_i32_1 = arith.constant 0 : i32
    return %c0_i32, %c0_i32_0 : i32, i32
  }
  func.func @transform_5(%arg0: i32) -> (i32, i32) {
    %c0_i32 = arith.constant 0 : i32
    %c0_i32_0 = arith.constant 0 : i32
    return %arg0, %c0_i32 : i32, i32
  }
}

</mosaic_0001>

<bundles_post_ra>
// kernel: tpu_custom_call.1
= control target key start
LH: loop header
LB: loop body
LE: loop exit
PB: predicated region body
PF: predicated region fallthrough
CT: control target
= control target key end

     0   :  { %10 = vsyncpa [#allocation3], 0  ;;  %s1240_s0 = inlined_call_operand.hbm [shape: bf16[16,128], index: 0, kind: input, shape index: {}]   ;;  %s1241_s1 = inlined_call_operand.hbm [shape: bf16[128,512], index: 1, kind: input, shape index: {}]   ;;  %s1242_s2 = inlined_call_operand.hbm [shape: f32[1,512], index: 2, kind: input, shape index: {}]   ;;  %s1243_s3 = inlined_call_operand.hbm [shape: bf16[512,128], index: 3, kind: input, shape index: {}]   ;;  %s1244_s4 = inlined_call_operand.vmem [shape: f32[1,128], index: 4, kind: input, shape index: {}]   ;;  %s1245_s5 = inlined_call_operand.hbm [shape: f32[16,128], index: 5, kind: output, shape index: {}]  }
   0x1   :  { %11 = vsyncpa [#allocation6], 0 }
   0x2   :  { %12 = vsyncpa [#allocation9], 0 }
   0x3   :  { %13 = vsyncpa [#allocation4], 0  ;;  %s1152_s18 = smov [#allocation5]  }
   0x4   :  { %s31_s19 = sshll.u32 %s1152_s18, 4  ;;  %s32_s19 = int_to_ptr.vmem [resolvable:$true] %s31_s19 }
   0x5   :  { %s1052_s20 = scalar_lea.vmem %s32_s19, 4096  ;;  %p1057_p1 = scmp.lt.s32.totalorder %s32_s19, %s32_s19 }
   0x6   :  { %p1053_p0 = scmp.ne.s32.totalorder %s32_s19, %s1052_s20  ;;  %p1058_p2 = scmp.lt.s32.totalorder %s1052_s20, %s1052_s20 }
   0x8   :  { %p1059_p3 = por %p1058_p2, %p1057_p1 }
   0xa   :  { %p1060_p4 = pnand %p1059_p3, %p1053_p0 }
   0xc   :  { %1063 = shalt.err (!%p1060_p4)
}
   0xd   :  { %s1153_s21 = smov 256   ;;  %s1154_s22 = smov 16  }
   0xe   :  { %37 = dma.hbm_to_vmem [thread:$0]  %s1241_s1, 4096, %s32_s19, [#allocation6], %s1153_s21, %s1153_s21, %s1154_s22  }
   0xf   :  { %s1155_s25 = smov [#allocation2]  }
  0x10   :  { %s19_s26 = sshll.u32 %s1155_s25, 4  ;;  %s20_s26 = int_to_ptr.vmem [resolvable:$true] %s19_s26 }
  0x11   :  { %s1072_s27 = scalar_lea.vmem %s20_s26, 128  ;;  %p1077_p6 = scmp.lt.s32.totalorder %s20_s26, %s20_s26 }
  0x12   :  { %p1073_p5 = scmp.ne.s32.totalorder %s20_s26, %s1072_s27  ;;  %p1078_p7 = scmp.lt.s32.totalorder %s1072_s27, %s1072_s27 }
  0x14   :  { %p1079_p8 = por %p1078_p7, %p1077_p6 }
  0x16   :  { %p1080_p9 = pnand %p1079_p8, %p1073_p5 }
  0x18   :  { %1083 = shalt.err (!%p1080_p9)
}
  0x19   :  { %s1156_s28 = smov 64   ;;  %s1157_s29 = smov 4  }
  0x1a   :  { %25 = dma.hbm_to_vmem [thread:$0]  %s1240_s0, 128, %s20_s26, [#allocation3], %s1156_s28, %s1156_s28, %s1157_s29  }
  0x1b   :  { %s1158_s7 = smov [#allocation7]   ;;  %s1159_s9 = smov [#allocation8]  }
  0x1c   :  { %s44_s8 = sshll.u32 %s1158_s7, 4  ;;  %s53_s1 = sshll.u32 %s1159_s9, 4  ;;  %s45_s8 = int_to_ptr.vmem [resolvable:$true] %s44_s8  ;;  %s54_s1 = int_to_ptr.vmem [resolvable:$true] %s53_s1 }
  0x1d   :  { %s1092_s10 = scalar_lea.vmem %s45_s8, 64  ;;  %p1097_p11 = scmp.lt.s32.totalorder %s45_s8, %s45_s8 }
  0x1e   :  { %p1093_p10 = scmp.ne.s32.totalorder %s45_s8, %s1092_s10  ;;  %p1098_p12 = scmp.lt.s32.totalorder %s1092_s10, %s1092_s10 }
  0x20   :  { %p1099_p13 = por %p1098_p12, %p1097_p11 }
  0x22   :  { %p1100_p0 = pnand %p1099_p13, %p1093_p10 }
  0x24   :  { %1103 = shalt.err (!%p1100_p0)
}
  0x25   :  { %47 = dma.hbm_to_vmem [thread:$0]  %s1242_s2, 64, %s45_s8, [#allocation6]  }
  0x26   :  { %s1112_s13 = scalar_lea.vmem %s54_s1, 4096  ;;  %p1117_p2 = scmp.lt.s32.totalorder %s54_s1, %s54_s1 }
  0x27   :  { %p1113_p1 = scmp.ne.s32.totalorder %s54_s1, %s1112_s13  ;;  %p1118_p3 = scmp.lt.s32.totalorder %s1112_s13, %s1112_s13 }
  0x29   :  { %p1119_p4 = por %p1118_p3, %p1117_p2 }
  0x2b   :  { %p1120_p5 = pnand %p1119_p4, %p1113_p1 }
  0x2d   :  { %1123 = shalt.err (!%p1120_p5)
}
  0x2e   :  { %59 = dma.hbm_to_vmem [thread:$0]  %s1243_s3, 4096, %s54_s1, [#allocation9], %s1156_s28, %s1156_s28, %s1157_s29  }
  0x2f   :  { %1144 = dma.done.wait [#allocation3], 128  }
  0x30   :  { %1145 = vsyncadd [#allocation3], 4294967168 }
  0x31   :  { %1146 = dma.done.wait [#allocation6], 4160  }
  0x32   :  { %1147 = vsyncadd [#allocation6], 4294963136 }
  0x33   :  { %1148 = dma.done.wait [#allocation9], 4096  }
  0x34   :  { %1149 = vsyncadd [#allocation9], 4294963200  ;;  %v1160_v0 = vmov 0   ;;  %v947_v1 = vld [vmem:[#allocation5 + $0xe4] ss:$16 sps:$4 sm:$0xff]   ;;  %v995_v33 = vld [vmem:[#allocation2] sm:$0xff]  }
  0x35   :  { %329 = vmatprep.mubr.bf16.mxu0 %v1160_v0  ;;  %372 = vmatprep.mubr.bf16.mxu1 %v1160_v0  ;;  %v949_v2 = vld [vmem:[#allocation5 + $0xec] ss:$16 sps:$4 sm:$0xff]   ;;  %v951_v3 = vld [vmem:[#allocation5 + $0xe0] ss:$16 sps:$4 sm:$0xff]   ;;  %v952_v4 = vld [vmem:[#allocation5 + $0xe8] ss:$16 sps:$4 sm:$0xff]  }
  0x36   :  { %297 = vmatprep.subr.bf16.mxu0 %v947_v1  ;;  %340 = vmatprep.subr.bf16.mxu1 %v949_v2  ;;  %v953_v5 = vld [vmem:[#allocation5 + $0xc4] ss:$16 sps:$4 sm:$0xff]   ;;  %v955_v6 = vld [vmem:[#allocation5 + $0xcc] ss:$16 sps:$4 sm:$0xff]   ;;  %v957_v7 = vld [vmem:[#allocation5 + $0xc0] ss:$16 sps:$4 sm:$0xff]   ;;  %v111_v2 = vlaneseq }
  0x37   :  { %298 = vmatpush1.bf16.msra.mxu0 %v951_v3  ;;  %341 = vmatpush1.bf16.msra.mxu1 %v952_v4  ;;  %v958_v8 = vld [vmem:[#allocation5 + $0xc8] ss:$16 sps:$4 sm:$0xff]   ;;  %v959_v9 = vld [vmem:[#allocation5 + $0xa4] ss:$16 sps:$4 sm:$0xff]   ;;  %v961_v10 = vld [vmem:[#allocation5 + $0xac] ss:$16 sps:$4 sm:$0xff]  }
  0x38   :  { %299 = vmatprep.subr.bf16.mxu0 %v953_v5  ;;  %342 = vmatprep.subr.bf16.mxu1 %v955_v6  ;;  %v963_v11 = vld [vmem:[#allocation5 + $0xa0] ss:$16 sps:$4 sm:$0xff]   ;;  %v964_v12 = vld [vmem:[#allocation5 + $0xa8] ss:$16 sps:$4 sm:$0xff]   ;;  %v965_v13 = vld [vmem:[#allocation5 + $0x84] ss:$16 sps:$4 sm:$0xff]  }
  0x39   :  { %v967_v14 = vld [vmem:[#allocation5 + $0x8c] ss:$16 sps:$4 sm:$0xff]   ;;  %v969_v15 = vld [vmem:[#allocation5 + $0x80] ss:$16 sps:$4 sm:$0xff]   ;;  %v970_v16 = vld [vmem:[#allocation5 + $0x88] ss:$16 sps:$4 sm:$0xff]  }
  0x3a   :  { %v971_v17 = vld [vmem:[#allocation5 + $0x64] ss:$16 sps:$4 sm:$0xff]   ;;  %v973_v18 = vld [vmem:[#allocation5 + $0x6c] ss:$16 sps:$4 sm:$0xff]   ;;  %v975_v19 = vld [vmem:[#allocation5 + $0x60] ss:$16 sps:$4 sm:$0xff]  }
  0x3b   :  { %300 = vmatpush1.bf16.msra.mxu0 %v957_v7  ;;  %343 = vmatpush1.bf16.msra.mxu1 %v958_v8  ;;  %v976_v20 = vld [vmem:[#allocation5 + $0x68] ss:$16 sps:$4 sm:$0xff]   ;;  %v977_v21 = vld [vmem:[#allocation5 + $0x44] ss:$16 sps:$4 sm:$0xff]   ;;  %v979_v22 = vld [vmem:[#allocation5 + $0x4c] ss:$16 sps:$4 sm:$0xff]  }
  0x3c   :  { %301 = vmatprep.subr.bf16.mxu0 %v959_v9  ;;  %344 = vmatprep.subr.bf16.mxu1 %v961_v10  ;;  %v981_v23 = vld [vmem:[#allocation5 + $0x40] ss:$16 sps:$4 sm:$0xff]   ;;  %v982_v24 = vld [vmem:[#allocation5 + $0x48] ss:$16 sps:$4 sm:$0xff]   ;;  %v983_v25 = vld [vmem:[#allocation5 + $0x24] ss:$16 sps:$4 sm:$0xff]  }
  0x3d   :  { %v985_v26 = vld [vmem:[#allocation5 + $0x2c] ss:$16 sps:$4 sm:$0xff]   ;;  %v987_v27 = vld [vmem:[#allocation5 + $0x20] ss:$16 sps:$4 sm:$0xff]   ;;  %v988_v28 = vld [vmem:[#allocation5 + $0x28] ss:$16 sps:$4 sm:$0xff]  }
  0x3e   :  { %v989_v29 = vld [vmem:[#allocation5 + $0x4] ss:$16 sps:$4 sm:$0xff]   ;;  %v991_v30 = vld [vmem:[#allocation5 + $0xc] ss:$16 sps:$4 sm:$0xff]   ;;  %v993_v31 = vld [vmem:[#allocation5] ss:$16 sps:$4 sm:$0xff]  }
  0x3f   :  { %302 = vmatpush1.bf16.msra.mxu0 %v963_v11  ;;  %345 = vmatpush1.bf16.msra.mxu1 %v964_v12  ;;  %v994_v32 = vld [vmem:[#allocation5 + $0x8] ss:$16 sps:$4 sm:$0xff]   ;;  %v996_v34 = vld [vmem:[#allocation8 + $0x78] sm:$0xff]   ;;  %v1004_v42 = vld [vmem:[#allocation8 + $0x68] sm:$0xff]   ;;  %v112_v3 = vshrl.u32 %v111_v2, 7  ;;  %s1161_s15 = smov [#allocation10]  }
  0x40   :  { %303 = vmatprep.subr.bf16.mxu0 %v965_v13  ;;  %346 = vmatprep.subr.bf16.mxu1 %v967_v14  ;;  %v997_v35 = vld [vmem:[#allocation8 + $0xf8] sm:$0xff]   ;;  %v1000_v38 = vld [vmem:[#allocation8 + $0x70] sm:$0xff]   ;;  %v1005_v43 = vld [vmem:[#allocation8 + $0xe8] sm:$0xff]   ;;  %s811_s16 = sshll.u32 %s1161_s15, 4  ;;  %s812_s16 = int_to_ptr.vmem [resolvable:$true] %s811_s16 }
  0x41   :  { %v998_v36 = vld [vmem:[#allocation8 + $0x38] sm:$0xff]   ;;  %v1001_v39 = vld [vmem:[#allocation8 + $0xf0] sm:$0xff]   ;;  %v1006_v44 = vld [vmem:[#allocation8 + $0x28] sm:$0xff]   ;;  %v113_v4 = vsub.s32 0, %v112_v3  ;;  %v121_v5 = vsub.s32 2, %v112_v3  ;;  %v117_v7 = vsub.s32 1, %v112_v3  ;;  %p1129_p7 = scmp.lt.s32.totalorder %s812_s16, %s812_s16 }
  0x42   :  { %v999_v37 = vld [vmem:[#allocation8 + $0xb8] sm:$0xff]   ;;  %v1002_v40 = vld [vmem:[#allocation8 + $0x30] sm:$0xff]   ;;  %v1007_v45 = vld [vmem:[#allocation8 + $0xa8] sm:$0xff]   ;;  %v125_v8 = vsub.s32 3, %v112_v3 }
  0x43   :  { %304 = vmatpush1.bf16.msra.mxu0 %v969_v15  ;;  %347 = vmatpush1.bf16.msra.mxu1 %v970_v16  ;;  %v1003_v41 = vld [vmem:[#allocation8 + $0xb0] sm:$0xff]   ;;  %v1008_v46 = vld [vmem:[#allocation8 + $0x60] sm:$0xff]   ;;  %v1012_v50 = vld [vmem:[#allocation8 + $0x58] sm:$0xff]  }
  0x44   :  { %305 = vmatprep.subr.bf16.mxu0 %v971_v17  ;;  %348 = vmatprep.subr.bf16.mxu1 %v973_v18  ;;  %v1009_v47 = vld [vmem:[#allocation8 + $0xe0] sm:$0xff]   ;;  %v1013_v51 = vld [vmem:[#allocation8 + $0xd8] sm:$0xff]   ;;  %v1016_v54 = vld [vmem:[#allocation8 + $0x50] sm:$0xff]  }
  0x45   :  { %v1010_v48 = vld [vmem:[#allocation8 + $0x20] sm:$0xff]   ;;  %v1014_v52 = vld [vmem:[#allocation8 + $0x18] sm:$0xff]   ;;  %v1017_v55 = vld [vmem:[#allocation8 + $0xd0] sm:$0xff]  }
  0x46   :  { %v1011_v49 = vld [vmem:[#allocation8 + $0xa0] sm:$0xff]   ;;  %v1015_v53 = vld [vmem:[#allocation8 + $0x98] sm:$0xff]   ;;  %v1018_v56 = vld [vmem:[#allocation8 + $0x10] sm:$0xff]  }
  0x47   :  { %306 = vmatpush1.bf16.msra.mxu0 %v975_v19  ;;  %349 = vmatpush1.bf16.msra.mxu1 %v976_v20  ;;  %v1019_v57 = vld [vmem:[#allocation8 + $0x90] sm:$0xff]   ;;  %v1020_v58 = vld [vmem:[#allocation8 + $0x48] sm:$0xff]   ;;  %v1024_v62 = vld [vmem:[#allocation8 + $0x40] sm:$0xff]  }
  0x48   :  { %307 = vmatprep.subr.bf16.mxu0 %v977_v21  ;;  %350 = vmatprep.subr.bf16.mxu1 %v979_v22  ;;  %v1021_v59 = vld [vmem:[#allocation8 + $0xc8] sm:$0xff]   ;;  %v1025_v63 = vld [vmem:[#allocation8 + $0xc0] sm:$0xff]   ;;  %v109_v6 = vld [vmem:[#allocation7] sm:$0xf] }
  0x49   :  { %v1022_v60 = vld [vmem:[#allocation8 + $0x8] sm:$0xff]   ;;  %v1026_v0 = vld [vmem:[#allocation8] sm:$0xff]   ;;  %v114_v9 = vrot.slane %v109_v6, %v113_v4  ;;  %v122_v10 = vrot.slane %v109_v6, %v121_v5  ;;  %v118_v11 = vrot.slane %v109_v6, %v117_v7  ;;  %v126_v12 = vrot.slane %v109_v6, %v125_v8 }
  0x4a   :  { %v1023_v61 = vld [vmem:[#allocation8 + $0x88] sm:$0xff]   ;;  %v1027_v1 = vld [vmem:[#allocation8 + $0x80] sm:$0xff]  }
  0x4b   :  { %308 = vmatpush1.bf16.msra.mxu0 %v981_v23  ;;  %351 = vmatpush1.bf16.msra.mxu1 %v982_v24 }
  0x4c   :  { %309 = vmatprep.subr.bf16.mxu0 %v983_v25  ;;  %352 = vmatprep.subr.bf16.mxu1 %v985_v26 }
  0x4f   :  { %310 = vmatpush1.bf16.msra.mxu0 %v987_v27  ;;  %353 = vmatpush1.bf16.msra.mxu1 %v988_v28 }
  0x50   :  { %311 = vmatprep.subr.bf16.mxu0 %v989_v29  ;;  %354 = vmatprep.subr.bf16.mxu1 %v991_v30 }
  0x53   :  { %312 = vmatpush1.bf16.msra.mxu0 %v993_v31  ;;  %355 = vmatpush1.bf16.msra.mxu1 %v994_v32 }
  0x54   :  { %891 = vmatprep.subr.bf16.mxu0 %v996_v34  ;;  %913 = vmatprep.subr.bf16.mxu1 %v997_v35 }
  0x56   :  { %330 = vmatmul.mubr.bf16.vlgmr.msra.gmra.mxu0 %v995_v33  ;;  %373 = vmatmul.mubr.bf16.vlgmr.msra.gmra.mxu1 %v995_v33 }
  0x57   :  { %892 = vmatpush3.bf16.msra.mxu0 %v998_v36  ;;  %914 = vmatpush3.bf16.msra.mxu1 %v999_v37 }
  0x58   :  { %893 = vmatprep.subr.bf16.mxu0 %v1000_v38  ;;  %915 = vmatprep.subr.bf16.mxu1 %v1001_v39 }
  0x5b   :  { %894 = vmatpush3.bf16.msra.mxu0 %v1002_v40  ;;  %916 = vmatpush3.bf16.msra.mxu1 %v1003_v41 }
  0x5c   :  { %895 = vmatprep.subr.bf16.mxu0 %v1004_v42  ;;  %917 = vmatprep.subr.bf16.mxu1 %v1005_v43 }
  0x5f   :  { %896 = vmatpush3.bf16.msra.mxu0 %v1006_v44  ;;  %918 = vmatpush3.bf16.msra.mxu1 %v1007_v45 }
  0x60   :  { %897 = vmatprep.subr.bf16.mxu0 %v1008_v46  ;;  %919 = vmatprep.subr.bf16.mxu1 %v1009_v47 }
  0x63   :  { %898 = vmatpush3.bf16.msra.mxu0 %v1010_v48  ;;  %920 = vmatpush3.bf16.msra.mxu1 %v1011_v49 }
  0x64   :  { %899 = vmatprep.subr.bf16.mxu0 %v1012_v50  ;;  %921 = vmatprep.subr.bf16.mxu1 %v1013_v51 }
  0x67   :  { %900 = vmatpush3.bf16.msra.mxu0 %v1014_v52  ;;  %922 = vmatpush3.bf16.msra.mxu1 %v1015_v53 }
  0x68   :  { %901 = vmatprep.subr.bf16.mxu0 %v1016_v54  ;;  %923 = vmatprep.subr.bf16.mxu1 %v1017_v55 }
  0x6b   :  { %902 = vmatpush3.bf16.msra.mxu0 %v1018_v56  ;;  %924 = vmatpush3.bf16.msra.mxu1 %v1019_v57 }
  0x6c   :  { %903 = vmatprep.subr.bf16.mxu0 %v1020_v58  ;;  %925 = vmatprep.subr.bf16.mxu1 %v1021_v59 }
  0x6f   :  { %904 = vmatpush3.bf16.msra.mxu0 %v1022_v60  ;;  %926 = vmatpush3.bf16.msra.mxu1 %v1023_v61 }
  0x70   :  { %905 = vmatprep.subr.bf16.mxu0 %v1024_v62  ;;  %927 = vmatprep.subr.bf16.mxu1 %v1025_v63 }
  0x73   :  { %906 = vmatpush3.bf16.msra.mxu0 %v1026_v0  ;;  %928 = vmatpush3.bf16.msra.mxu1 %v1027_v1 }
 0x116   :  { %v331_v13 = vpop.f32.mrf.mxu0  ;;  %v374_v14 = vpop.f32.mrf.mxu1 }
 0x117   :  { %v1206_v15 = vadd.f32 %v331_v13, %v114_v9  ;;  %v1208_v16 = vadd.f32 %v374_v14, %v122_v10 }
 0x118   :  { %v333_v17 = vpop.f32.mrf.mxu0  ;;  %v376_v18 = vpop.f32.mrf.mxu1 }
 0x119   :  { %v391_v19 = vmul.f32 0.044715, %v1206_v15  ;;  %v393_v20 = vmul.f32 0.044715, %v1208_v16  ;;  %v334_v21 = vadd.f32 %v333_v17, %v118_v11  ;;  %v1212_v22 = vadd.f32 %v376_v18, %v126_v12 }
 0x11a   :  { %v335_v23 = vpop.f32.mrf.mxu0  ;;  %v378_v24 = vpop.f32.mrf.mxu1  ;;  %v383_v13 = vmul.f32 0.5, %v1206_v15 }
 0x11b   :  { %v399_v25 = vmul.f32 %v391_v19, %v1206_v15  ;;  %v401_v26 = vmul.f32 %v393_v20, %v1208_v16  ;;  %v392_v27 = vmul.f32 0.044715, %v334_v21  ;;  %v394_v28 = vmul.f32 0.044715, %v1212_v22 }
 0x11c   :  { %v336_v29 = vadd.f32 %v335_v23, %v114_v9  ;;  %v1217_v30 = vadd.f32 %v378_v24, %v122_v10  ;;  %v337_v31 = vpop.f32.mrf.mxu0  ;;  %v380_v32 = vpop.f32.mrf.mxu1 }
 0x11d   :  { %v407_v33 = vmul.f32 %v399_v25, %v1206_v15  ;;  %v409_v34 = vmul.f32 %v401_v26, %v1208_v16  ;;  %v400_v35 = vmul.f32 %v392_v27, %v334_v21  ;;  %v402_v36 = vmul.f32 %v394_v28, %v1212_v22 }
 0x11e   :  { %v395_v37 = vmul.f32 0.044715, %v336_v29  ;;  %v397_v38 = vmul.f32 0.044715, %v1217_v30  ;;  %v338_v39 = vadd.f32 %v337_v31, %v118_v11  ;;  %v381_v40 = vadd.f32 %v380_v32, %v126_v12 }
 0x11f   :  { %v415_v41 = vadd.f32 %v407_v33, %v1206_v15  ;;  %v417_v42 = vadd.f32 %v409_v34, %v1208_v16  ;;  %v408_v43 = vmul.f32 %v400_v35, %v334_v21  ;;  %v410_v44 = vmul.f32 %v402_v36, %v1212_v22 }
 0x120   :  { %v403_v45 = vmul.f32 %v395_v37, %v336_v29  ;;  %v405_v46 = vmul.f32 %v397_v38, %v1217_v30  ;;  %v396_v47 = vmul.f32 0.044715, %v338_v39  ;;  %v398_v48 = vmul.f32 0.044715, %v381_v40 }
 0x121   :  { %v423_v49 = vmul.f32 0.7978846, %v415_v41  ;;  %v425_v50 = vmul.f32 0.7978846, %v417_v42  ;;  %v416_v51 = vadd.f32 %v408_v43, %v334_v21  ;;  %v418_v57 = vadd.f32 %v410_v44, %v1212_v22  ;;  %v858_v44 = vld [vmem:[%s1244_s4] ss:$0 sm:$0xff] }
 0x122   :  { %v411_v52 = vmul.f32 %v403_v45, %v336_v29  ;;  %v413_v53 = vmul.f32 %v405_v46, %v1217_v30  ;;  %v404_v54 = vmul.f32 %v396_v47, %v338_v39  ;;  %v406_v55 = vmul.f32 %v398_v48, %v381_v40  ;;  %s1124_s4 = scalar_lea.vmem %s812_s16, 256 }
 0x123   :  { %v424_v56 = vmul.f32 0.7978846, %v416_v51  ;;  %1028 = vtanh.f32 %v423_v49  ;;  %v426_v62 = vmul.f32 0.7978846, %v418_v57  ;;  %v384_v11 = vmul.f32 0.5, %v334_v21  ;;  %p1125_p6 = scmp.ne.s32.totalorder %s812_s16, %s1124_s4  ;;  %p1130_p8 = scmp.lt.s32.totalorder %s1124_s4, %s1124_s4 }
 0x124   :  { %v419_v58 = vadd.f32 %v411_v52, %v336_v29  ;;  %v421_v59 = vadd.f32 %v413_v53, %v1217_v30  ;;  %v412_v60 = vmul.f32 %v404_v54, %v338_v39  ;;  %1030 = vtanh.f32 %v425_v50 }
 0x125   :  { %v414_v61 = vmul.f32 %v406_v55, %v381_v40  ;;  %1032 = vtanh.f32 %v424_v56  ;;  %v387_v19 = vmul.f32 0.5, %v336_v29  ;;  %v388_v25 = vmul.f32 0.5, %v338_v39  ;;  %p1131_p9 = por %p1130_p8, %p1129_p7 }
 0x126   :  { %v427_v63 = vmul.f32 0.7978846, %v419_v58  ;;  %v429_v0 = vmul.f32 0.7978846, %v421_v59  ;;  %v420_v1 = vadd.f32 %v412_v60, %v338_v39  ;;  %1034 = vtanh.f32 %v426_v62 }
 0x127   :  { %v422_v2 = vadd.f32 %v414_v61, %v381_v40  ;;  %v389_v27 = vmul.f32 0.5, %v1217_v30  ;;  %v386_v31 = vmul.f32 0.5, %v1212_v22  ;;  %v390_v32 = vmul.f32 0.5, %v381_v40  ;;  %p1132_p10 = pnand %p1131_p9, %p1125_p6 }
 0x128   :  { %1036 = vtanh.f32 %v427_v63  ;;  %v428_v3 = vmul.f32 0.7978846, %v420_v1  ;;  %v385_v15 = vmul.f32 0.5, %v1208_v16 }
 0x129   :  { %1038 = vtanh.f32 %v429_v0  ;;  %v430_v4 = vmul.f32 0.7978846, %v422_v2 }
 0x12a   :  { %1040 = vtanh.f32 %v428_v3 }
 0x12b   :  { %1042 = vtanh.f32 %v430_v4 }
 0x130   :  { %v1029_v5 = vpop.eup %1028 }
 0x131   :  { %v1031_v6 = vpop.eup %1030  ;;  %v439_v20 = vadd.f32 1.0, %v1029_v5 }
 0x132   :  { %v1033_v7 = vpop.eup %1032  ;;  %v441_v28 = vadd.f32 1.0, %v1031_v6 }
 0x133   :  { %v1035_v8 = vpop.eup %1034  ;;  %v440_v12 = vadd.f32 1.0, %v1033_v7  ;;  %v447_v38 = vmul.f32 %v439_v20, %v383_v13 }
 0x134   :  { %v442_v18 = vadd.f32 1.0, %v1035_v8  ;;  %v449_v42 = vmul.f32 %v441_v28, %v385_v15 }
 0x135   :  { %v1037_v9 = vpop.eup %1036  ;;  %v448_v34 = vmul.f32 %v440_v12, %v384_v11 }
 0x136   :  { %v1039_v10 = vpop.eup %1038  ;;  %v443_v14 = vadd.f32 1.0, %v1037_v9  ;;  %v450_v37 = vmul.f32 %v442_v18, %v386_v31 }
 0x137   :  { %v1041_v17 = vpop.eup %1040  ;;  %v445_v23 = vadd.f32 1.0, %v1039_v10 }
 0x138   :  { %v1043_v24 = vpop.eup %1042  ;;  %v444_v26 = vadd.f32 1.0, %v1041_v17  ;;  %v451_v21 = vmul.f32 %v443_v14, %v387_v19 }
 0x139   :  { %v446_v33 = vadd.f32 1.0, %v1043_v24  ;;  %v453_v36 = vmul.f32 %v445_v23, %v389_v27 }
 0x13a   :  { %v452_v35 = vmul.f32 %v444_v26, %v388_v25  ;;  %v455_v43 = vpack.c.bf16 %v451_v21, %v447_v38 }
 0x13b   :  { %v454_v29 = vmul.f32 %v446_v33, %v390_v32  ;;  %v457_v30 = vpack.c.bf16 %v453_v36, %v449_v42 }
 0x13c   :  { %v456_v41 = vpack.c.bf16 %v452_v35, %v448_v34 }
 0x13d   :  { %v458_v39 = vpack.c.bf16 %v454_v29, %v450_v37 }
 0x13e   :  { %754 = vmatprep.mubr.bf16.mxu0 %v456_v41 }
 0x13f   :  { %795 = vmatprep.mubr.bf16.mxu1 %v458_v39  ;;  %755 = vmatmul.mubr.bf16.vlgmr.msra.gmra.mxu0 %v455_v43 }
 0x140   :  { %796 = vmatmul.mubr.bf16.vlgmr.msra.gmra.mxu1 %v457_v30 }
 0x1ff   :  { %v907_v22 = vpop.f32.mrf.mxu0 }
 0x200   :  { %v929_v40 = vpop.f32.mrf.mxu1 }
 0x201   :  { %v908_v16 = vpop.f32.mrf.mxu0 }
 0x202   :  { %v909_v45 = vadd.f32 %v908_v16, %v907_v22  ;;  %v930_v46 = vpop.f32.mrf.mxu1 }
 0x203   :  { %v910_v47 = vpop.f32.mrf.mxu0  ;;  %v931_v49 = vadd.f32 %v930_v46, %v929_v40 }
 0x204   :  { %v757_v48 = vadd.f32 %v909_v45, %v858_v44  ;;  %v932_v50 = vpop.f32.mrf.mxu1 }
 0x205   :  { %v911_v51 = vpop.f32.mrf.mxu0 }
 0x206   :  { %v798_v52 = vadd.f32 %v931_v49, %v757_v48  ;;  %v912_v53 = vadd.f32 %v911_v51, %v910_v47  ;;  %v933_v54 = vpop.f32.mrf.mxu1 }
 0x207   :  { %v934_v56 = vadd.f32 %v933_v54, %v932_v50 }
 0x208   :  { %804 = vst [vmem:[#allocation10] sm:$0xff] %v798_v52  ;;  %v760_v55 = vadd.f32 %v912_v53, %v858_v44 }
 0x20a   :  { %v801_v57 = vadd.f32 %v934_v56, %v760_v55 }
 0x20c   :  { %805 = vst [vmem:[#allocation10 + $0x8] sm:$0xff] %v801_v57 }
 0x20d   :  { %1135 = shalt.err (!%p1132_p10)
}
 0x20e   :  { %s1162_s17 = smov 128   ;;  %s1163_s18 = smov 8  }
 0x20f   :  { %817 = dma.vmem_to_hbm [thread:$0]  %s812_s16, 256, %s1245_s5, [#allocation4], %s1162_s17, %s1162_s17, %s1163_s18  }
 0x210   :  { %1150 = dma.done.wait [#allocation4], 256  }
 0x211   :  { %1151 = vsyncadd [#allocation4], 4294967040 }
 0x212   :  { %821 = vsyncpa [#allocation3], 1 }
 0x213   :  { %822 = vsyncpa [#allocation6], 1 }
 0x214   :  { %823 = vsyncpa [#allocation9], 1 }
 0x215   :  { %824 = vsyncpa [#allocation4], 1 }

</bundles_post_ra>
